<compile_context>
chip_gen: v6e
topology: v6e:2x2x1
jax: 0.10.0
libtpu: 0.0.40
codegen_flags: <defaults>
</compile_context>

<pallas_src>
import jax
import jax.numpy as jnp
from jax.experimental import pallas as pl
from jax.experimental.pallas import tpu as pltpu


def gating_kernel(x_ref, w_ref, b_ref, o_ref):
    # MXU matmul with f32 accumulation (operands are bf16).
    logits = jnp.dot(x_ref[...], w_ref[...],
                     preferred_element_type=jnp.float32)
    logits = logits + b_ref[...]                       # [tb, Ep] + [1, Ep]
    m = jnp.max(logits, axis=-1, keepdims=True)        # [tb, 1]
    e = jnp.exp(logits - m)                            # [tb, Ep]
    denom = jnp.sum(e, axis=-1, keepdims=True)         # [tb, 1]
    # EUP reciprocal + VPU multiply instead of a per-row divide chain.
    o_ref[...] = (e * pl.reciprocal(denom, approx=True)).astype(o_ref.dtype)


def _pick_block_b(B, D, E_pad, budget_bytes):
    """Largest batch tile (multiple of 16) whose double-buffered working set
    plus the resident weight/bias fits a conservative scoped-VMEM budget."""
    x_bytes, w_bytes, out_bytes = 2, 2, 4              # bf16 x/W, f32 out
    resident = 2 * D * E_pad * w_bytes + 2 * E_pad * 4  # W + bias (2 buffers)
    b_cap = ((B + 15) // 16) * 16                      # no tile larger than batch
    for cand in (1024, 512, 256, 128, 64, 32, 16):
        per_step = 2 * cand * (D * x_bytes + E_pad * out_bytes)
        if resident + per_step <= budget_bytes or cand == 16:
            return min(cand, b_cap)
    return min(16, b_cap)


def gating_forward(x, w, b, *, block_b=None,
                   vmem_budget_bytes=12 * 1024 * 1024):
    """x: [B, D], w: [D, E], b: [E]  ->  softmax(x @ w + b, axis=1) as [B, E]."""
    B, D = x.shape
    E = w.shape[1]
    out_dtype = x.dtype

    # Lane-dense expert dimension: pad E up to a multiple of 128.
    E_pad = max(128, ((E + 127) // 128) * 128)
    w_pad = jnp.zeros((D, E_pad), jnp.float32).at[:, :E].set(
        w.astype(jnp.float32))
    # Padded experts get a huge negative bias -> exp() == 0 after max-subtract.
    b_pad = jnp.full((1, E_pad), -1e30, jnp.float32).at[0, :E].set(
        b.astype(jnp.float32))

    # bf16 operands for the MXU; softmax stays f32 inside the kernel.
    x_op = x.astype(jnp.bfloat16)
    w_op = w_pad.astype(jnp.bfloat16)

    if block_b is None:
        # Conservative 12 MiB working-set budget fits the default scoped VMEM
        # on v5e (16 MiB) and v6e/v7x (32 MiB) without raising vmem_limit_bytes.
        block_b = _pick_block_b(B, D, E_pad, vmem_budget_bytes)

    # Pad the batch up to a multiple of block_b (zero rows, sliced off below).
    B_pad = ((B + block_b - 1) // block_b) * block_b
    if B_pad != B:
        x_op = jnp.zeros((B_pad, D), x_op.dtype).at[:B].set(x_op)

    # NOTE: if D * E_pad ever gets large enough that resident W dominates VMEM
    # (huge input_dim / expert counts), add a K-tiling grid axis with an f32
    # accumulator; for typical gating shapes whole-W residency is optimal.
    out_padded = pl.pallas_call(
        gating_kernel,
        out_shape=jax.ShapeDtypeStruct((B_pad, E_pad), out_dtype),
        grid_spec=pltpu.PrefetchScalarGridSpec(
            num_scalar_prefetch=0,
            grid=(B_pad // block_b,),
            in_specs=[
                pl.BlockSpec((block_b, D), lambda i: (i, 0)),   # x tile
                pl.BlockSpec((D, E_pad), lambda i: (0, 0)),     # resident W
                pl.BlockSpec((1, E_pad), lambda i: (0, 0)),     # resident bias
            ],
            out_specs=pl.BlockSpec((block_b, E_pad), lambda i: (i, 0)),
        ),
        compiler_params=pltpu.CompilerParams(
            dimension_semantics=("parallel",)),
    )(x_op, w_op, b_pad)

    return out_padded[:B, :E]


def reference_forward(x, w, b):
    return jax.nn.softmax(x @ w + b, axis=1)


if __name__ == "__main__":
    key = jax.random.PRNGKey(0)
    k_x, k_w, k_b = jax.random.split(key, 3)

    batch, input_dim, num_experts = 8, 32, 8

    # Deterministic params mimicking nn.Linear's uniform(-1/sqrt(D), 1/sqrt(D)).
    bound = 1.0 / jnp.sqrt(jnp.float32(input_dim))
    w = jax.random.uniform(k_w, (input_dim, num_experts), jnp.float32,
                           minval=-bound, maxval=bound)
    b = jax.random.uniform(k_b, (num_experts,), jnp.float32,
                           minval=-bound, maxval=bound)
    x = jax.random.normal(k_x, (batch, input_dim), jnp.float32)

    out = jax.block_until_ready(gating_forward(x, w, b))

    # Reference with operands quantized the same way as the kernel (bf16 matmul
    # inputs, f32 math), plus a looser check against the pure-f32 reference.
    x_q = x.astype(jnp.bfloat16).astype(jnp.float32)
    w_q = w.astype(jnp.bfloat16).astype(jnp.float32)
    ref_q = reference_forward(x_q, w_q, b)
    ref_f32 = reference_forward(x, w, b)

    assert out.shape == (batch, num_experts)
    assert jnp.allclose(out, ref_q, atol=2e-3), \
        float(jnp.max(jnp.abs(out - ref_q)))
    assert jnp.allclose(out, ref_f32, atol=2e-2)
    assert jnp.allclose(jnp.sum(out, axis=1), jnp.ones((batch,)), atol=3e-3)

    print("KERNEL_OK")
</pallas_src>

<mosaic_0001>
module attributes {stable_mosaic.version = 11 : i64} {
  func.func @gating_kernel(%arg0: i32, %arg1: memref<16x32xbf16, #tpu.memory_space<vmem>>, %arg2: memref<32x128xbf16, #tpu.memory_space<vmem>>, %arg3: memref<1x128xf32, #tpu.memory_space<vmem>>, %arg4: memref<16x128xf32, #tpu.memory_space<vmem>>) attributes {dimension_semantics = [#tpu.dimension_semantics<parallel>], iteration_bounds = array<i64: 1>, scalar_prefetch = 0 : i64, scratch_operands = 0 : i64, tpu.core_type = #tpu.core_type<tc>, window_params = [{transform_indices = @transform_0, window_bounds = array<i64: 16, 32>}, {pipeline_mode = #tpu.pipeline_mode<synchronous>, transform_indices = @transform_1, window_bounds = array<i64: 32, 128>}, {pipeline_mode = #tpu.pipeline_mode<synchronous>, transform_indices = @transform_2, window_bounds = array<i64: 1, 128>}, {transform_indices = @transform_3, window_bounds = array<i64: 16, 128>}]} {
    %c0 = arith.constant 0 : index
    %c0_0 = arith.constant 0 : index
    %0 = vector.load %arg1[%c0, %c0_0] : memref<16x32xbf16, #tpu.memory_space<vmem>>, vector<16x32xbf16>
    %c0_1 = arith.constant 0 : index
    %c0_2 = arith.constant 0 : index
    %1 = vector.load %arg2[%c0_1, %c0_2] : memref<32x128xbf16, #tpu.memory_space<vmem>>, vector<32x128xbf16>
    %cst = arith.constant dense<0.000000e+00> : vector<16x128xf32>
    %2 = tpu.matmul %0, %1, %cst {dimension_numbers = #tpu.dot_dimension_numbers<[1], [0], [0], [1], [0, 0, 1, 1], [], []>} : vector<16x32xbf16>, vector<32x128xbf16>, vector<16x128xf32> -> vector<16x128xf32>
    %c0_3 = arith.constant 0 : index
    %c0_4 = arith.constant 0 : index
    %3 = vector.load %arg3[%c0_3, %c0_4] : memref<1x128xf32, #tpu.memory_space<vmem>>, vector<1x128xf32>
    %4 = vector.broadcast %3 : vector<1x128xf32> to vector<16x128xf32>
    %5 = arith.addf %2, %4 : vector<16x128xf32>
    %cst_5 = arith.constant dense<0xFF800000> : vector<16xf32>
    %6 = vector.multi_reduction <maximumf>, %5, %cst_5 [1] : vector<16x128xf32> to vector<16xf32>
    %7 = vector.shape_cast %6 : vector<16xf32> to vector<16x1xf32>
    %8 = vector.broadcast %7 : vector<16x1xf32> to vector<16x128xf32>
    %9 = arith.subf %5, %8 : vector<16x128xf32>
    %10 = math.exp %9 : vector<16x128xf32>
    %cst_6 = arith.constant dense<0.000000e+00> : vector<16xf32>
    %11 = vector.multi_reduction <add>, %10, %cst_6 [1] : vector<16x128xf32> to vector<16xf32>
    %12 = vector.shape_cast %11 : vector<16xf32> to vector<16x1xf32>
    %13 = tpu.reciprocal %12 {approx = true} : vector<16x1xf32> -> vector<16x1xf32>
    %14 = vector.broadcast %13 : vector<16x1xf32> to vector<16x128xf32>
    %15 = arith.mulf %10, %14 : vector<16x128xf32>
    %c0_7 = arith.constant 0 : index
    %c0_8 = arith.constant 0 : index
    %16 = vector.load %arg4[%c0_7, %c0_8] : memref<16x128xf32, #tpu.memory_space<vmem>>, vector<16x128xf32>
    tpu.vector_store %arg4[%c0_7, %c0_8], %15 {strides = array<i32>} : memref<16x128xf32, #tpu.memory_space<vmem>>, vector<16x128xf32>,
    return
  }
  func.func @transform_0(%arg0: i32) -> (i32, i32) {
    %c0_i32 = arith.constant 0 : i32
    %c0_i32_0 = arith.constant 0 : i32
    return %arg0, %c0_i32 : i32, i32
  }
  func.func @transform_1(%arg0: i32) -> (i32, i32) {
    %c0_i32 = arith.constant 0 : i32
    %c0_i32_0 = arith.constant 0 : i32
    %c0_i32_1 = arith.constant 0 : i32
    return %c0_i32, %c0_i32_0 : i32, i32
  }
  func.func @transform_2(%arg0: i32) -> (i32, i32) {
    %c0_i32 = arith.constant 0 : i32
    %c0_i32_0 = arith.constant 0 : i32
    %c0_i32_1 = arith.constant 0 : i32
    return %c0_i32, %c0_i32_0 : i32, i32
  }
  func.func @transform_3(%arg0: i32) -> (i32, i32) {
    %c0_i32 = arith.constant 0 : i32
    %c0_i32_0 = arith.constant 0 : i32
    return %arg0, %c0_i32 : i32, i32
  }
}

</mosaic_0001>

<bundles_post_ra>
// kernel: tpu_custom_call.1
= control target key start
LH: loop header
LB: loop body
LE: loop exit
PB: predicated region body
PF: predicated region fallthrough
CT: control target
= control target key end

     0   :  { %8 = vsyncpa [#allocation3], 0  ;;  %s300_s0 = inlined_call_operand.hbm [shape: bf16[16,32], index: 0, kind: input, shape index: {}]   ;;  %s301_s1 = inlined_call_operand.hbm [shape: bf16[32,128], index: 1, kind: input, shape index: {}]   ;;  %s302_s2 = inlined_call_operand.vmem [shape: f32[1,128], index: 2, kind: input, shape index: {}]   ;;  %s303_s3 = inlined_call_operand.hbm [shape: f32[16,128], index: 3, kind: output, shape index: {}]  }
   0x1   :  { %9 = vsyncpa [#allocation6], 0 }
   0x2   :  { %10 = vsyncpa [#allocation4], 0  ;;  %s259_s12 = smov [#allocation2]  }
   0x3   :  { %s16_s13 = sshll.u32 %s259_s12, 4  ;;  %s17_s13 = int_to_ptr.vmem [resolvable:$true] %s16_s13 }
   0x4   :  { %s201_s14 = scalar_lea.vmem %s17_s13, 128  ;;  %p206_p1 = scmp.lt.s32.totalorder %s17_s13, %s17_s13 }
   0x5   :  { %p202_p0 = scmp.ne.s32.totalorder %s17_s13, %s201_s14  ;;  %p207_p2 = scmp.lt.s32.totalorder %s201_s14, %s201_s14 }
   0x7   :  { %p208_p3 = por %p207_p2, %p206_p1 }
   0x9   :  { %p209_p4 = pnand %p208_p3, %p202_p0 }
   0xb   :  { %212 = shalt.err (!%p209_p4)
}
   0xc   :  { %s260_s15 = smov 64   ;;  %s261_s16 = smov 4  }
   0xd   :  { %22 = dma.hbm_to_vmem [thread:$0]  %s300_s0, 128, %s17_s13, [#allocation3], %s260_s15, %s260_s15, %s261_s16  }
   0xe   :  { %s262_s19 = smov [#allocation5]  }
   0xf   :  { %s28_s20 = sshll.u32 %s262_s19, 4  ;;  %s29_s20 = int_to_ptr.vmem [resolvable:$true] %s28_s20 }
  0x10   :  { %s221_s21 = scalar_lea.vmem %s29_s20, 256  ;;  %p226_p6 = scmp.lt.s32.totalorder %s29_s20, %s29_s20 }
  0x11   :  { %p222_p5 = scmp.ne.s32.totalorder %s29_s20, %s221_s21  ;;  %p227_p7 = scmp.lt.s32.totalorder %s221_s21, %s221_s21 }
  0x13   :  { %p228_p8 = por %p227_p7, %p226_p6 }
  0x15   :  { %p229_p9 = pnand %p228_p8, %p222_p5 }
  0x17   :  { %232 = shalt.err (!%p229_p9)
}
  0x18   :  { %34 = dma.hbm_to_vmem [thread:$0]  %s301_s1, 256, %s29_s20, [#allocation6], %s260_s15, %s260_s15, %s261_s16  }
  0x19   :  { %253 = dma.done.wait [#allocation3], 128  }
  0x1a   :  { %254 = vsyncadd [#allocation3], 4294967168 }
  0x1b   :  { %255 = dma.done.wait [#allocation6], 256  }
  0x1c   :  { %256 = vsyncadd [#allocation6], 4294967040  ;;  %v263_v0 = vmov 0.0   ;;  %vm264_vm0 = vmmov 0   ;;  %v182_v1 = vld [vmem:[#allocation5 + $0x8] sm:$0xff]   ;;  %v183_v2 = vld [vmem:[#allocation5] sm:$0xff]  }
  0x1d   :  { %165 = vmatprep.subr.bf16.mxu0 %v263_v0  ;;  %169 = vmatprep.mubr.msk.bf16.mxu0 %vm264_vm0, %v263_v0  ;;  %v184_v3 = vld [vmem:[#allocation2] sm:$0xff]   ;;  %vm74_vm1 = vcmask 261120   ;;  %s265_s1 = smov [#allocation7]  }
  0x1e   :  { %166 = vmatpush3.bf16.msra.mxu0 %v182_v1  ;;  %v157_v4 = vld [vmem:[%s302_s2] ss:$0 sm:$0xff]  ;;  %s144_s2 = sshll.u32 %s265_s1, 4  ;;  %s145_s2 = int_to_ptr.vmem [resolvable:$true] %s144_s2 }
  0x1f   :  { %167 = vmatprep.subr.bf16.mxu0 %v263_v0  ;;  %s233_s25 = scalar_lea.vmem %s145_s2, 256  ;;  %p238_p11 = scmp.lt.s32.totalorder %s145_s2, %s145_s2 }
  0x20   :  { %p234_p10 = scmp.ne.s32.totalorder %s145_s2, %s233_s25  ;;  %p239_p12 = scmp.lt.s32.totalorder %s233_s25, %s233_s25 }
  0x22   :  { %168 = vmatpush3.bf16.msra.mxu0 %v183_v2  ;;  %p240_p13 = por %p239_p12, %p238_p11 }
  0x24   :  { %p241_p0 = pnand %p240_p13, %p234_p10 }
  0x25   :  { %170 = vmatmul.mubr.msk.bf16.vlgmr.msra.gmra.mxu0 %vm74_vm1, %v184_v3 }
  0xe5   :  { %v112_v5 = vpop.f32.mrf.mxu0 }
  0xe6   :  { %v113_v6 = vadd.f32 %v157_v4, %v112_v5 }
  0xe7   :  { %v171_v7 = vpop.f32.mrf.mxu0 }
  0xe8   :  { %119 = vmax.xlane.f32.xlu0 %v113_v6 }
  0xe9   :  { %v115_v8 = vpop.f32.mrf.mxu0 }
  0xea   :  { %v116_v9 = vadd.f32 %v157_v4, %v115_v8 }
  0xeb   :  { %v172_v10 = vpop.f32.mrf.mxu0 }
  0xec   :  { %121 = vmax.xlane.f32.xlu0 %v116_v9 }
 0x171   :  { %v120_v11 = vpop.xlane.xlu0 %119 }
 0x172   :  { %v123_v12 = vsub.f32 %v113_v6, %v120_v11 }
 0x174   :  { %v125_v13 = vmul.f32 1.442695, %v123_v12 }
 0x175   :  { %v122_v14 = vpop.xlane.xlu0 %121 }
 0x176   :  { %185 = vpow2.f32 %v125_v13  ;;  %v124_v15 = vsub.f32 %v116_v9, %v122_v14 }
 0x178   :  { %v127_v16 = vmul.f32 1.442695, %v124_v15 }
 0x17a   :  { %187 = vpow2.f32 %v127_v16 }
 0x183   :  { %v186_v17 = vpop.eup %185 }
 0x184   :  { %129 = vadd.xlane.f32.xlu1 %v186_v17 }
 0x187   :  { %v188_v18 = vpop.eup %187 }
 0x188   :  { %131 = vadd.xlane.f32.xlu1 %v188_v18 }
 0x20d   :  { %v130_v19 = vpop.xlane.xlu1 %129 }
 0x20e   :  { %189 = vrcp.f32 %v130_v19 }
 0x211   :  { %v132_v20 = vpop.xlane.xlu1 %131 }
 0x212   :  { %191 = vrcp.f32 %v132_v20 }
 0x21b   :  { %v190_v21 = vpop.eup %189 }
 0x21c   :  { %v135_v22 = vmul.f32 %v190_v21, %v186_v17 }
 0x21e   :  { %137 = vst [vmem:[#allocation7] sm:$0xff] %v135_v22 }
 0x21f   :  { %v192_v23 = vpop.eup %191 }
 0x220   :  { %v136_v24 = vmul.f32 %v192_v23, %v188_v18 }
 0x222   :  { %138 = vst [vmem:[#allocation7 + $0x8] sm:$0xff] %v136_v24 }
 0x223   :  { %244 = shalt.err (!%p241_p0)
}
 0x224   :  { %s266_s26 = smov 128   ;;  %s267_s27 = smov 8  }
 0x225   :  { %150 = dma.vmem_to_hbm [thread:$0]  %s145_s2, 256, %s303_s3, [#allocation4], %s266_s26, %s266_s26, %s267_s27  }
 0x226   :  { %257 = dma.done.wait [#allocation4], 256  }
 0x227   :  { %258 = vsyncadd [#allocation4], 4294967040 }
 0x228   :  { %154 = vsyncpa [#allocation3], 1 }
 0x229   :  { %155 = vsyncpa [#allocation6], 1 }
 0x22a   :  { %156 = vsyncpa [#allocation4], 1 }

</bundles_post_ra>
